<compile_context>
chip_gen: v7x
topology: tpu7x:2x2x1
jax: 0.10.0
libtpu: 0.0.40
codegen_flags: <defaults>
</compile_context>

<pallas_src>
import jax
import jax.numpy as jnp
from jax.experimental import pallas as pl
from jax.experimental.pallas import tpu as pltpu


def _disc_align_kernel(scal_ref, res_ref, lat_ref, w1r_ref, w1l_ref,
                       b1_ref, w2_ref, o_ref):
    # scal_ref: SMEM (2,) f32   -> [alpha, b2]
    # res_ref:  (R, TB) bf16    (batch on lanes)
    # lat_ref:  (L, TB) bf16
    # w1r_ref:  (H, R)  bf16,  w1l_ref: (H, L) bf16
    # b1_ref:   (H, 1)  f32,   w2_ref:  (H, 1) f32
    # o_ref:    (1, TB) f32    (lane-dense output row)
    alpha = scal_ref[0]
    b2 = scal_ref[1]

    # fc1 (concat fused via the split weight); f32 accumulation on the MXU.
    h = (jnp.dot(w1r_ref[...], res_ref[...], preferred_element_type=jnp.float32)
         + jnp.dot(w1l_ref[...], lat_ref[...], preferred_element_type=jnp.float32)
         + b1_ref[...])                                      # (H, TB)

    # LeakyReLU(negative_slope=alpha) in f32 on the VPU.
    h = jnp.where(h >= 0.0, h, alpha * h)

    # fc2 (out_features == 1): VPU multiply + sublane reduce instead of MXU.
    z = jnp.sum(h * w2_ref[...], axis=0, keepdims=True) + b2  # (1, TB)

    # Sigmoid (exp on the EUP).
    o_ref[...] = 1.0 / (1.0 + jnp.exp(-z))


def discriminator_align_forward(res, latent_feature, params, alpha,
                                tile_b=8192):
    """res: (B, resSize), latent_feature: (B, latent_size) -> (B, 1).

    params are in PyTorch layout: w1 (H, R+L), b1 (H,), w2 (1, H), b2 (1,).
    Concat order matches the module: res columns first, latent columns second.
    """
    w1, b1, w2, b2 = params
    B, R = res.shape
    L = latent_feature.shape[1]
    H = w1.shape[0]

    # Batch tile: multiple of 128 (lane width).  At TB=8192 bf16 the two input
    # tiles double-buffered are < 2 MiB -> well inside scoped-VMEM defaults.
    TB = min(tile_b, pl.cdiv(B, 128) * 128)
    B_pad = pl.cdiv(B, TB) * TB
    nb = B_pad // TB

    # Feature-major, bf16 activations; zero-pad the batch (lane) axis.
    res_t = jnp.pad(res.astype(jnp.bfloat16).T, ((0, 0), (0, B_pad - B)))
    lat_t = jnp.pad(latent_feature.astype(jnp.bfloat16).T,
                    ((0, 0), (0, B_pad - B)))

    # Split fc1 weight: first R columns act on res, the rest on latent_feature.
    w1r = w1[:, :R].astype(jnp.bfloat16)            # (H, R)
    w1l = w1[:, R:].astype(jnp.bfloat16)            # (H, L)
    b1c = b1.reshape(H, 1).astype(jnp.float32)      # (H, 1)
    w2c = w2.reshape(H, 1).astype(jnp.float32)      # (H, 1)
    scalars = jnp.stack([jnp.float32(alpha),
                         b2.reshape(()).astype(jnp.float32)])  # (2,) -> SMEM

    out_t = pl.pallas_call(
        _disc_align_kernel,
        out_shape=jax.ShapeDtypeStruct((1, B_pad), jnp.float32),
        grid=(nb,),
        in_specs=[
            pl.BlockSpec(memory_space=pltpu.MemorySpace.SMEM),   # [alpha, b2]
            pl.BlockSpec((R, TB), lambda i: (0, i)),             # res^T tile
            pl.BlockSpec((L, TB), lambda i: (0, i)),             # lat^T tile
            pl.BlockSpec((H, R), lambda i: (0, 0)),              # w1_res (resident)
            pl.BlockSpec((H, L), lambda i: (0, 0)),              # w1_lat (resident)
            pl.BlockSpec((H, 1), lambda i: (0, 0)),              # b1     (resident)
            pl.BlockSpec((H, 1), lambda i: (0, 0)),              # w2     (resident)
        ],
        out_specs=pl.BlockSpec((1, TB), lambda i: (0, i)),
        compiler_params=pltpu.CompilerParams(
            dimension_semantics=("parallel",)),
    )(scalars, res_t, lat_t, w1r, w1l, b1c, w2c)

    # Lane-dense (1, B_pad) row -> (B, 1) to match the PyTorch module output.
    return out_t[0, :B].reshape(B, 1)


def init_params(key, latent_feature_size, res_size, net_e_hid):
    """weights_init analog: Linear W ~ N(0, 0.02), b = 0 (PyTorch layout)."""
    d_in = latent_feature_size + res_size
    k1, k2 = jax.random.split(key)
    w1 = 0.02 * jax.random.normal(k1, (net_e_hid, d_in), dtype=jnp.float32)
    b1 = jnp.zeros((net_e_hid,), dtype=jnp.float32)
    w2 = 0.02 * jax.random.normal(k2, (1, net_e_hid), dtype=jnp.float32)
    b2 = jnp.zeros((1,), dtype=jnp.float32)
    return w1, b1, w2, b2


def reference_forward(res, latent_feature, params, alpha):
    """Pure-JAX f32 reference (PyTorch semantics) for correctness checking."""
    w1, b1, w2, b2 = params
    x = jnp.concatenate([res, latent_feature], axis=1)
    h = x @ w1.T + b1
    h = jnp.where(h >= 0.0, h, alpha * h)
    z = h @ w2.T + b2
    return jax.nn.sigmoid(z)


if __name__ == "__main__":
    # Small, module-consistent shapes (opt dict analog):
    #   latent_feature_size=16, resSize=32, netE_hid=32, activate_index=0.2
    B = 8
    latent_feature_size = 16
    res_size = 32
    net_e_hid = 32
    alpha = 0.2

    key = jax.random.PRNGKey(0)
    k_res, k_lat, k_par = jax.random.split(key, 3)
    res = jax.random.normal(k_res, (B, res_size), dtype=jnp.float32)
    latent_feature = jax.random.normal(k_lat, (B, latent_feature_size),
                                       dtype=jnp.float32)
    params = init_params(k_par, latent_feature_size, res_size, net_e_hid)

    out = discriminator_align_forward(res, latent_feature, params, alpha)
    out = jax.block_until_ready(out)

    ref = reference_forward(res, latent_feature, params, alpha)
    assert out.shape == (B, 1), out.shape
    # bf16 matmul operands (f32 accumulation) -> tolerance looser than pure f32.
    assert jnp.allclose(out, ref, atol=1e-3, rtol=1e-3), (out, ref)

    print("KERNEL_OK")
</pallas_src>

<mosaic_0001>
module attributes {stable_mosaic.version = 11 : i64} {
  func.func @_disc_align_kernel(%arg0: i32, %arg1: memref<2xf32, #tpu.memory_space<smem>>, %arg2: memref<32x128xbf16, #tpu.memory_space<vmem>>, %arg3: memref<16x128xbf16, #tpu.memory_space<vmem>>, %arg4: memref<32x32xbf16, #tpu.memory_space<vmem>>, %arg5: memref<32x16xbf16, #tpu.memory_space<vmem>>, %arg6: memref<32x1xf32, #tpu.memory_space<vmem>>, %arg7: memref<32x1xf32, #tpu.memory_space<vmem>>, %arg8: memref<1x128xf32, #tpu.memory_space<vmem>>) attributes {dimension_semantics = [#tpu.dimension_semantics<parallel>], iteration_bounds = array<i64: 1>, scalar_prefetch = 0 : i64, scratch_operands = 0 : i64, tpu.core_type = #tpu.core_type<tc>, window_params = [{transform_indices = @transform_0, window_bounds = array<i64: 2>}, {transform_indices = @transform_1, window_bounds = array<i64: 32, 128>}, {transform_indices = @transform_2, window_bounds = array<i64: 16, 128>}, {pipeline_mode = #tpu.pipeline_mode<synchronous>, transform_indices = @transform_3, window_bounds = array<i64: 32, 32>}, {pipeline_mode = #tpu.pipeline_mode<synchronous>, transform_indices = @transform_4, window_bounds = array<i64: 32, 16>}, {pipeline_mode = #tpu.pipeline_mode<synchronous>, transform_indices = @transform_5, window_bounds = array<i64: 32, 1>}, {pipeline_mode = #tpu.pipeline_mode<synchronous>, transform_indices = @transform_6, window_bounds = array<i64: 32, 1>}, {transform_indices = @transform_7, window_bounds = array<i64: 1, 128>}]} {
    %c0 = arith.constant 0 : index
    %0 = memref.load %arg1[%c0] : memref<2xf32, #tpu.memory_space<smem>>
    %c1 = arith.constant 1 : index
    %1 = memref.load %arg1[%c1] : memref<2xf32, #tpu.memory_space<smem>>
    %c0_0 = arith.constant 0 : index
    %c0_1 = arith.constant 0 : index
    %2 = vector.load %arg4[%c0_0, %c0_1] : memref<32x32xbf16, #tpu.memory_space<vmem>>, vector<32x32xbf16>
    %c0_2 = arith.constant 0 : index
    %c0_3 = arith.constant 0 : index
    %3 = vector.load %arg2[%c0_2, %c0_3] : memref<32x128xbf16, #tpu.memory_space<vmem>>, vector<32x128xbf16>
    %cst = arith.constant dense<0.000000e+00> : vector<32x128xf32>
    %4 = tpu.matmul %2, %3, %cst {dimension_numbers = #tpu.dot_dimension_numbers<[1], [0], [0], [1], [0, 0, 1, 1], [], []>} : vector<32x32xbf16>, vector<32x128xbf16>, vector<32x128xf32> -> vector<32x128xf32>
    %c0_4 = arith.constant 0 : index
    %c0_5 = arith.constant 0 : index
    %5 = vector.load %arg5[%c0_4, %c0_5] : memref<32x16xbf16, #tpu.memory_space<vmem>>, vector<32x16xbf16>
    %c0_6 = arith.constant 0 : index
    %c0_7 = arith.constant 0 : index
    %6 = vector.load %arg3[%c0_6, %c0_7] : memref<16x128xbf16, #tpu.memory_space<vmem>>, vector<16x128xbf16>
    %cst_8 = arith.constant dense<0.000000e+00> : vector<32x128xf32>
    %7 = tpu.matmul %5, %6, %cst_8 {dimension_numbers = #tpu.dot_dimension_numbers<[1], [0], [0], [1], [0, 0, 1, 1], [], []>} : vector<32x16xbf16>, vector<16x128xbf16>, vector<32x128xf32> -> vector<32x128xf32>
    %8 = arith.addf %4, %7 : vector<32x128xf32>
    %c0_9 = arith.constant 0 : index
    %c0_10 = arith.constant 0 : index
    %9 = vector.load %arg6[%c0_9, %c0_10] : memref<32x1xf32, #tpu.memory_space<vmem>>, vector<32x1xf32>
    %10 = vector.broadcast %9 : vector<32x1xf32> to vector<32x128xf32>
    %11 = arith.addf %8, %10 : vector<32x128xf32>
    %cst_11 = arith.constant 0.000000e+00 : f32
    %12 = vector.broadcast %cst_11 : f32 to vector<32x128xf32>
    %13 = arith.cmpf oge, %11, %12 : vector<32x128xf32>
    %14 = vector.broadcast %0 : f32 to vector<32x128xf32>
    %15 = arith.mulf %14, %11 : vector<32x128xf32>
    %16 = arith.select %13, %11, %15 : vector<32x128xi1>, vector<32x128xf32>
    %c0_12 = arith.constant 0 : index
    %c0_13 = arith.constant 0 : index
    %17 = vector.load %arg7[%c0_12, %c0_13] : memref<32x1xf32, #tpu.memory_space<vmem>>, vector<32x1xf32>
    %18 = vector.broadcast %17 : vector<32x1xf32> to vector<32x128xf32>
    %19 = arith.mulf %16, %18 : vector<32x128xf32>
    %cst_14 = arith.constant dense<0.000000e+00> : vector<128xf32>
    %20 = vector.multi_reduction <add>, %19, %cst_14 [0] : vector<32x128xf32> to vector<128xf32>
    %21 = vector.shape_cast %20 : vector<128xf32> to vector<1x128xf32>
    %22 = vector.broadcast %1 : f32 to vector<1x128xf32>
    %23 = arith.addf %21, %22 : vector<1x128xf32>
    %cst_15 = arith.constant 0.000000e+00 : f32
    %24 = vector.broadcast %cst_15 : f32 to vector<1x128xf32>
    %25 = arith.subf %24, %23 : vector<1x128xf32>
    %26 = math.exp %25 : vector<1x128xf32>
    %cst_16 = arith.constant 1.000000e+00 : f32
    %27 = vector.broadcast %cst_16 : f32 to vector<1x128xf32>
    %28 = arith.addf %27, %26 : vector<1x128xf32>
    %cst_17 = arith.constant 1.000000e+00 : f32
    %29 = vector.broadcast %cst_17 : f32 to vector<1x128xf32>
    %30 = arith.divf %29, %28 : vector<1x128xf32>
    %c0_18 = arith.constant 0 : index
    %c0_19 = arith.constant 0 : index
    %31 = vector.load %arg8[%c0_18, %c0_19] : memref<1x128xf32, #tpu.memory_space<vmem>>, vector<1x128xf32>
    tpu.vector_store %arg8[%c0_18, %c0_19], %30 {strides = array<i32>} : memref<1x128xf32, #tpu.memory_space<vmem>>, vector<1x128xf32>,
    return
  }
  func.func @transform_0(%arg0: i32) -> i32 {
    %c0_i32 = arith.constant 0 : i32
    %c0_i32_0 = arith.constant 0 : i32
    return %c0_i32 : i32
  }
  func.func @transform_1(%arg0: i32) -> (i32, i32) {
    %c0_i32 = arith.constant 0 : i32
    %c0_i32_0 = arith.constant 0 : i32
    return %c0_i32, %arg0 : i32, i32
  }
  func.func @transform_2(%arg0: i32) -> (i32, i32) {
    %c0_i32 = arith.constant 0 : i32
    %c0_i32_0 = arith.constant 0 : i32
    return %c0_i32, %arg0 : i32, i32
  }
  func.func @transform_3(%arg0: i32) -> (i32, i32) {
    %c0_i32 = arith.constant 0 : i32
    %c0_i32_0 = arith.constant 0 : i32
    %c0_i32_1 = arith.constant 0 : i32
    return %c0_i32, %c0_i32_0 : i32, i32
  }
  func.func @transform_4(%arg0: i32) -> (i32, i32) {
    %c0_i32 = arith.constant 0 : i32
    %c0_i32_0 = arith.constant 0 : i32
    %c0_i32_1 = arith.constant 0 : i32
    return %c0_i32, %c0_i32_0 : i32, i32
  }
  func.func @transform_5(%arg0: i32) -> (i32, i32) {
    %c0_i32 = arith.constant 0 : i32
    %c0_i32_0 = arith.constant 0 : i32
    %c0_i32_1 = arith.constant 0 : i32
    return %c0_i32, %c0_i32_0 : i32, i32
  }
  func.func @transform_6(%arg0: i32) -> (i32, i32) {
    %c0_i32 = arith.constant 0 : i32
    %c0_i32_0 = arith.constant 0 : i32
    %c0_i32_1 = arith.constant 0 : i32
    return %c0_i32, %c0_i32_0 : i32, i32
  }
  func.func @transform_7(%arg0: i32) -> (i32, i32) {
    %c0_i32 = arith.constant 0 : i32
    %c0_i32_0 = arith.constant 0 : i32
    return %c0_i32, %arg0 : i32, i32
  }
}

</mosaic_0001>

<bundles_post_ra>
// kernel: tpu_custom_call.1
= control target key start
LH: loop header
LB: loop body
LE: loop exit
PB: predicated region body
PF: predicated region fallthrough
CT: control target
= control target key end

     0   :  { %12 = vsyncpa [#allocation4], 0  ;;  %s505_s0 = inlined_call_operand.vmem [shape: f32[2], index: 0, kind: input, shape index: {}]   ;;  %s506_s1 = inlined_call_operand.vmem [shape: bf16[32,128], index: 1, kind: input, shape index: {}]   ;;  %s507_s2 = inlined_call_operand.vmem [shape: bf16[16,128], index: 2, kind: input, shape index: {}]   ;;  %s508_s3 = inlined_call_operand.vmem [shape: bf16[32,32], index: 3, kind: input, shape index: {}]   ;;  %s509_s4 = inlined_call_operand.vmem [shape: bf16[32,16], index: 4, kind: input, shape index: {}]   ;;  %s510_s5 = inlined_call_operand.vmem [shape: f32[32,1], index: 5, kind: input, shape index: {}]   ;;  %s511_s6 = inlined_call_operand.vmem [shape: f32[32,1], index: 6, kind: input, shape index: {}]   ;;  %s512_s7 = inlined_call_operand.hbm [shape: f32[1,128], index: 7, kind: output, shape index: {}]  }
   0x1   :  { %13 = vsyncpa [#allocation3], 0  ;;  %s20_s26 = sshll.u32 %s505_s0, 4  ;;  %s21_s26 = int_to_ptr.vmem [resolvable:$true] %s20_s26 }
   0x2   :  { %s362_s27 = scalar_lea.vmem %s21_s26, 16  ;;  %p367_p1 = scmp.lt.s32.totalorder %s21_s26, %s21_s26 }
   0x3   :  { %p363_p0 = scmp.ne.s32.totalorder %s21_s26, %s362_s27  ;;  %p368_p2 = scmp.lt.s32.totalorder %s362_s27, %s362_s27 }
   0x5   :  { %p369_p3 = por %p368_p2, %p367_p1 }
   0x7   :  { %p370_p4 = pnand %p369_p3, %p363_p0 }
   0x9   :  { %373 = shalt.err (!%p370_p4)
}
   0xa   :  { %s400_s28 = smov [#allocation2]  }
   0xb   :  { %23 = dma.vmem_to_smem %s21_s26, 16, %s400_s28, [#allocation4]  }
   0xc   :  { %396 = dma.done.wait [#allocation4], 16  }
   0xd   :  { %397 = vsyncadd [#allocation4], 4294967280 }
   0xe   :  { %39 = sfence }
   0xf   :  { %v351_v0 = vld [vmem:[%s506_s1] sm:$0xff]   ;;  %vm73_vm0 = vcmask 130048   ;;  %v354_v3 = vld [vmem:[%s506_s1 + $0x8] sm:$0xff]   ;;  %vm151_vm1 = vcmask 261120   ;;  %v401_v6 = vmov 0   ;;  %v209_v9 = vld [vmem:[%s510_s5 + $0x10] sm:$0xff] }
  0x10   :  { %v352_v1 = vld [vmem:[%s507_s2] sm:$0xff]   ;;  %334 = vmatprep.subr.bf16.mxu0 %v351_v0  ;;  %v355_v4 = vld [vmem:[%s509_s4 + $0x8] sm:$0xff]   ;;  %349 = vset.pattern.permute.xlu0 %v401_v6  ;;  %v210_v11 = vld [vmem:[%s510_s5 + $0x18] sm:$0xff]  ;;  %s402_s8 = smov [#allocation5]  }
  0x11   :  { %v353_v2 = vld [vmem:[%s509_s4] sm:$0xff]   ;;  %328 = vmatprep.subr.bf16.mxu1 %v352_v1  ;;  %335 = vmatpush3.bf16.msra.mxu0 %v351_v0  ;;  %v357_v7 = vld [vmem:[%s508_s3 + $0x8] sm:$0xff]   ;;  %v250_v14 = vld [vmem:[%s511_s6 + $0x10] sm:$0xff]  ;;  %s300_s9 = sshll.u32 %s402_s8, 4  ;;  %s301_s9 = int_to_ptr.vmem [resolvable:$true] %s300_s9 }
  0x12   :  { %329 = vmatpush3.bf16.msra.mxu1 %v352_v1  ;;  %330 = vmatprep.mubr.msk.bf16.mxu1 %vm73_vm0, %v353_v2  ;;  %v356_v5 = vld [vmem:[%s508_s3] sm:$0xff]   ;;  %v208_v10 = vld [vmem:[%s510_s5 + $0x8] sm:$0xff]  ;;  %v251_v15 = vld [vmem:[%s511_s6 + $0x18] sm:$0xff]  ;;  %s374_s0 = scalar_lea.vmem %s301_s9, 16  ;;  %s378_s10 = scalar_lea.vmem %s301_s9, 32 }
  0x13   :  { %336 = vmatprep.subr.bf16.mxu0 %v354_v3  ;;  %350 = vset.pattern.permute.xlu1 %v401_v6  ;;  %v207_v8 = vld [vmem:[%s510_s5] sm:$0xff]  ;;  %v249_v13 = vld [vmem:[%s511_s6 + $0x8] sm:$0xff]  ;;  %s41_s5 = sld [smem:[#allocation2]]  ;;  %p375_p5 = scmp.ne.s32.totalorder %s301_s9, %s374_s0 }
  0x14   :  { %338 = vmatprep.mubr.msk.bf16.mxu0 %vm151_vm1, %v356_v5  ;;  %213 = vperm.xlu0 %349, %v207_v8   ;;  %v248_v12 = vld [vmem:[%s511_s6] sm:$0xff]  ;;  %s309_s6 = sld [smem:[#allocation2 + $0x1]]  ;;  %p379_p6 = scmp.lt.s32.totalorder %s301_s9, %s301_s9 }
  0x15   :  { %331 = vmatmul.mubr.msk.bf16.vlgmr.msra.gmra.mrb[0].mxu1 %vm73_vm0, %v355_v4  ;;  %337 = vmatpush3.bf16.msra.mxu0 %v354_v3  ;;  %p380_p7 = scmp.lt.s32.totalorder %s378_s10, %s374_s0 }
  0x16   :  { %223 = vperm.xlu1 %350, %v209_v9  }
  0x17   :  { %p381_p8 = por %p380_p7, %p379_p6 }
  0x18   :  { %339 = vmatmul.mubr.msk.bf16.vlgmr.msra.gmra.mrb[0].mxu0 %vm151_vm1, %v357_v7  ;;  %218 = vperm.xlu0 %349, %v208_v10  }
  0x19   :  { %v239_v30 = vstv %s41_s5  ;;  %p382_p9 = pnand %p381_p8, %p375_p5 }
  0x1a   :  { %228 = vperm.xlu1 %350, %v210_v11   ;;  %v285_v61 = vstv %s309_s6 }
  0x1c   :  { %254 = vperm.xlu0 %349, %v248_v12  }
  0x1e   :  { %259 = vperm.xlu1 %350, %v249_v13  }
  0x20   :  { %264 = vperm.xlu0 %349, %v250_v14  }
  0x22   :  { %269 = vperm.xlu1 %350, %v251_v15  }
  0x93   :  { %v214_v16 = vpop.permute.xlu0 %213 }
  0x95   :  { %v224_v17 = vpop.permute.xlu1 %223 }
  0x97   :  { %v219_v20 = vpop.permute.xlu0 %218 }
  0x99   :  { %v229_v26 = vpop.permute.xlu1 %228 }
  0x9b   :  { %v255_v36 = vpop.permute.xlu0 %254 }
  0x9d   :  { %v260_v40 = vpop.permute.xlu1 %259 }
  0x9f   :  { %v265_v48 = vpop.permute.xlu0 %264 }
  0xa1   :  { %v270_v52 = vpop.permute.xlu1 %269 }
  0xe8   :  { %v332_v18 = vpop.f32.mrb[0].mxu1 }
  0xe9   :  { %v114_v19 = vpop.f32.mrb[1].mxu1 }
  0xea   :  { %v333_v21 = vpop.f32.mrb[2].mxu1 }
  0xeb   :  { %v117_v22 = vpop.f32.mrb[3].mxu1  ;;  %v340_v23 = vpop.f32.mrb[0].mxu0 }
  0xec   :  { %v201_v24 = vadd.f32 %v340_v23, %v332_v18  ;;  %v192_v25 = vpop.f32.mrb[1].mxu0 }
  0xed   :  { %v193_v27 = vadd.f32 %v192_v25, %v114_v19  ;;  %v341_v28 = vpop.f32.mrb[2].mxu0 }
  0xee   :  { %v233_v29 = vadd.f32 %v224_v17, %v201_v24  ;;  %v204_v31 = vadd.f32 %v341_v28, %v333_v21  ;;  %v195_v32 = vpop.f32.mrb[3].mxu0 }
  0xef   :  { %v231_v33 = vadd.f32 %v214_v16, %v193_v27  ;;  %v196_v34 = vadd.f32 %v195_v32, %v117_v22 }
  0xf0   :  { %v234_v35 = vadd.f32 %v229_v26, %v204_v31  ;;  %v242_v37 = vmul.f32 %v239_v30, %v233_v29  ;;  %vm237_vm3 = vcmp.ge.f32.partialorder %v233_v29, 0.0 }
  0xf1   :  { %vm235_vm2 = vcmp.ge.f32.partialorder %v231_v33, 0.0  ;;  %v240_v38 = vmul.f32 %v239_v30, %v231_v33  ;;  %v232_v39 = vadd.f32 %v219_v20, %v196_v34 }
  0xf2   :  { %v243_v42 = vmul.f32 %v239_v30, %v234_v35  ;;  %vm238_vm5 = vcmp.ge.f32.partialorder %v234_v35, 0.0  ;;  %v246_v44 = vsel %vm237_vm3, %v233_v29, %v242_v37 }
  0xf3   :  { %v244_v41 = vsel %vm235_vm2, %v231_v33, %v240_v38  ;;  %vm236_vm4 = vcmp.ge.f32.partialorder %v232_v39, 0.0  ;;  %v241_v43 = vmul.f32 %v239_v30, %v232_v39  ;;  %v274_v50 = vmul.f32 %v265_v48, %v246_v44 }
  0xf4   :  { %v272_v46 = vmul.f32 %v255_v36, %v244_v41  ;;  %v247_v49 = vsel %vm238_vm5, %v234_v35, %v243_v42 }
  0xf5   :  { %v245_v45 = vsel %vm236_vm4, %v232_v39, %v241_v43  ;;  %v275_v53 = vmul.f32 %v270_v52, %v247_v49 }
  0xf6   :  { %v273_v47 = vmul.f32 %v260_v40, %v245_v45 }
  0xf8   :  { %v276_v51 = vadd.f32 %v273_v47, %v272_v46 }
  0xfa   :  { %v277_v54 = vadd.f32 %v276_v51, %v274_v50 }
  0xfc   :  { %v278_v55 = vadd.f32 %v277_v54, %v275_v53 }
  0xfe   :  { %v279_v56 = vrot.slane %v278_v55, 4 }
 0x100   :  { %v280_v57 = vadd.f32 %v279_v56, %v278_v55 }
 0x102   :  { %v281_v58 = vrot.slane %v280_v57, 2 }
 0x104   :  { %v282_v59 = vadd.f32 %v281_v58, %v280_v57 }
 0x106   :  { %v283_v60 = vrot.slane %v282_v59, 1 }
 0x108   :  { %v284_v62 = vadd.f32 %v283_v60, %v282_v59 }
 0x10a   :  { %v286_v63 = vadd.f32 %v285_v61, %v284_v62 }
 0x10c   :  { %v287_v0 = vsub.f32 0.0, %v286_v63 }
 0x10e   :  { %v288_v1 = vmul.f32 1.442695, %v287_v0 }
 0x110   :  { %358 = vpow2.f32 %v288_v1 }
 0x11a   :  { %v359_v2 = vpop.eup %358 }
 0x11b   :  { %v290_v3 = vadd.f32 1.0, %v359_v2 }
 0x11d   :  { %360 = vrcp.f32 %v290_v3 }
 0x127   :  { %v361_v4 = vpop.eup %360 }
 0x128   :  { %293 = vst [vmem:[#allocation5] sm:$0x1] %v361_v4 }
 0x129   :  { %385 = shalt.err (!%p382_p9)
}
 0x12a   :  { %s386_s13 = scalar_lea.hbm %s512_s7, 16 }
 0x12b   :  { %p387_p10 = scmp.ne.s32.totalorder %s512_s7, %s386_s13  ;;  %p390_p11 = scmp.lt.u32.totalorder %s386_s13, %s512_s7 }
 0x12d   :  { %p392_p12 = pnand %p390_p11, %p387_p10 }
 0x12f   :  { %395 = shalt.err (!%p392_p12)
}
 0x130   :  { %303 = dma.vmem_to_hbm [thread:$0]  %s301_s9, 16, %s512_s7, [#allocation3]  }
 0x131   :  { %398 = dma.done.wait [#allocation3], 16  }
 0x132   :  { %399 = vsyncadd [#allocation3], 4294967280 }
 0x133   :  { %307 = vsyncpa [#allocation3], 1 }
 0x134   :  { %308 = vsyncpa [#allocation4], 1 }

</bundles_post_ra>
